<compile_context>
chip_gen: v5e
topology: v5e:2x2
jax: 0.10.0
libtpu: 0.0.40
codegen_flags: <defaults>
</compile_context>

<pallas_src>
import functools

import jax
import jax.numpy as jnp
from jax.experimental import pallas as pl
from jax.experimental.pallas import tpu as pltpu


def _round_up(x, m):
    return (x + m - 1) // m * m


def _block_diag(w, p):
    """[k, n] -> [p*k, p*n] with p copies of w on the diagonal (built once, in XLA)."""
    k, n = w.shape
    eye = jnp.eye(p, dtype=w.dtype)
    return (eye[:, None, :, None] * w[None, :, None, :]).reshape(p * k, p * n)


def _seg_rotate(v, pos, seg, s):
    """Exact cyclic rotation by s within each contiguous `seg`-lane segment (last axis).

    Built from two full-axis static rolls + a lane mask; the mask exactly shields the
    full-axis wrap-around, so every lane only ever sees values from its own segment.
    """
    fwd = jnp.roll(v, -s, axis=-1)        # v[..., l + s]
    bwd = jnp.roll(v, seg - s, axis=-1)   # v[..., l + s - seg]
    return jnp.where(pos < seg - s, fwd, bwd)


def actor_kernel(x_ref, w1_ref, b1_ref, w2_ref, b2_ref, w3_ref, b3_ref, o_ref, *, action_dim):
    xp = x_ref[...]  # (rows, P*S) — P batch rows packed per 128-lane row

    # fc1/fc2/fc3 on block-diagonal weights: each A-wide (H-wide) lane segment is one batch row.
    h1 = jnp.maximum(
        jnp.dot(xp, w1_ref[...], preferred_element_type=jnp.float32) + b1_ref[...], 0.0)
    h2 = jnp.maximum(
        jnp.dot(h1, w2_ref[...], preferred_element_type=jnp.float32) + b2_ref[...], 0.0)
    logits = jnp.dot(h2, w3_ref[...], preferred_element_type=jnp.float32) + b3_ref[...]

    A = action_dim
    pos = jax.lax.broadcasted_iota(jnp.int32, logits.shape, 1) % A  # lane index within segment

    # Exact per-segment max: log-step cyclic tournament (valid for any A; max is idempotent).
    m = logits
    s = 1
    while s < A:
        m = jnp.maximum(m, _seg_rotate(m, pos, A, s))
        s *= 2

    e = jnp.exp(logits - m)

    # Exact per-segment sum (broadcast to every lane of the segment).
    if A & (A - 1) == 0:
        # recursive doubling — exact cover when A is a power of two
        d = e
        s = 1
        while s < A:
            d = d + _seg_rotate(d, pos, A, s)
            s *= 2
    else:
        # general A: rotate-by-1 accumulation (A-1 exact steps)
        d = e
        cur = e
        for _ in range(A - 1):
            cur = _seg_rotate(cur, pos, A, 1)
            d = d + cur

    # EUP approx reciprocal + one Newton step (~1e-7 rel error) keeps the 1e-5 tolerances.
    r = pl.reciprocal(d, approx=True)
    r = r * (2.0 - d * r)

    o_ref[...] = (e * r).astype(o_ref.dtype)


def actor_forward(x, params, *, block_rows_cap=8192):
    """x: [B, state_dim] float32 -> [B, action_dim] float32 softmax probabilities."""
    w1, b1, w2, b2, w3, b3 = params
    B, S = x.shape
    H = w1.shape[1]
    A = w3.shape[1]

    # Rows packed per 128-lane row (lane-dense input when P*S is a multiple of 128).
    P = max(1, min(128 // S, 16)) if S <= 128 else 1

    # Block-diagonal packed weights / tiled biases (tiny; constant-folds under jit).
    w1p, b1p = _block_diag(w1, P), jnp.tile(b1, (1, P))
    w2p, b2p = _block_diag(w2, P), jnp.tile(b2, (1, P))
    w3p, b3p = _block_diag(w3, P), jnp.tile(b3, (1, P))

    ALIGN = 8 * P                       # packed-row blocks must stay 8-sublane aligned
    B_align = _round_up(B, ALIGN)
    if B_align <= max(2 * ALIGN, 512):
        block_b = B_align               # tiny batch: single grid step (launch-bound anyway)
    else:
        # >=2 (evenly sized) grid steps so the "parallel" axis can shard across v7x's 2 TCs
        cap = _round_up(block_rows_cap, ALIGN)
        n_steps = max(2, pl.cdiv(B_align, cap))
        block_b = _round_up(pl.cdiv(B_align, n_steps), ALIGN)
    grid_n = pl.cdiv(B_align, block_b)
    B_pad = grid_n * block_b

    if B_pad != B:
        # zero rows -> well-defined (uniform) softmax in their own segments, sliced off below
        x = jnp.pad(x, ((0, B_pad - B), (0, 0)))

    R = B_pad // P                      # packed rows total
    Rb = block_b // P                   # packed rows per block (multiple of 8)
    xp = x.reshape(R, P * S)            # pure row-major reshape: row r <- batch rows r*P..r*P+P-1

    kernel = functools.partial(actor_kernel, action_dim=A)

    flops = 2 * B_pad * (S * H + H * H + H * A)
    bytes_accessed = 4 * (B_pad * S + B_pad * A
                          + P * P * (S * H + H * H + H * A) + P * (2 * H + A))

    out = pl.pallas_call(
        kernel,
        out_shape=jax.ShapeDtypeStruct((R, P * A), jnp.float32),
        grid=(grid_n,),
        in_specs=[
            pl.BlockSpec((Rb, P * S), lambda i: (i, 0)),       # packed activations (lane-dense)
            # constant index_map -> weights/biases stay VMEM-resident across grid steps
            pl.BlockSpec((P * S, P * H), lambda i: (0, 0)),    # W1 block-diagonal
            pl.BlockSpec((1, P * H), lambda i: (0, 0)),        # b1 tiled
            pl.BlockSpec((P * H, P * H), lambda i: (0, 0)),    # W2 block-diagonal
            pl.BlockSpec((1, P * H), lambda i: (0, 0)),        # b2 tiled
            pl.BlockSpec((P * H, P * A), lambda i: (0, 0)),    # W3 block-diagonal
            pl.BlockSpec((1, P * A), lambda i: (0, 0)),        # b3 tiled
        ],
        out_specs=pl.BlockSpec((Rb, P * A), lambda i: (i, 0)),
        compiler_params=pltpu.CompilerParams(
            dimension_semantics=("parallel",),                 # batch blocks are independent
        ),
        cost_estimate=pl.CostEstimate(
            flops=flops,
            transcendentals=B_pad * A,                         # exp
            bytes_accessed=bytes_accessed,
        ),
    )(xp, w1p, b1p, w2p, b2p, w3p, b3p)

    # unpack lane segments back to [B, action_dim] (row-major consistent with the input packing)
    return out.reshape(B_pad, A)[:B]


def init_params(key, state_dim, action_dim, hidden=32):
    """Deterministic synthetic parameters (PyTorch nn.Linear-style uniform init)."""
    ks = jax.random.split(key, 6)

    def linear(kw, kb, fan_in, fan_out):
        bound = 1.0 / jnp.sqrt(float(fan_in))
        w = jax.random.uniform(kw, (fan_in, fan_out), jnp.float32, -bound, bound)
        b = jax.random.uniform(kb, (1, fan_out), jnp.float32, -bound, bound)
        return w, b

    w1, b1 = linear(ks[0], ks[1], state_dim, hidden)
    w2, b2 = linear(ks[2], ks[3], hidden, hidden)
    w3, b3 = linear(ks[4], ks[5], hidden, action_dim)
    return (w1, b1, w2, b2, w3, b3)


def reference_forward(x, params):
    w1, b1, w2, b2, w3, b3 = params
    h1 = jnp.maximum(x @ w1 + b1, 0.0)
    h2 = jnp.maximum(h1 @ w2 + b2, 0.0)
    return jax.nn.softmax(h2 @ w3 + b3, axis=-1)


if __name__ == "__main__":
    key = jax.random.PRNGKey(0)
    kx, kp = jax.random.split(key)

    state_dim = 16
    action_dim = 8
    batch = 10  # not a multiple of the pack factor -> exercises intra-pack batch padding

    x = jax.random.normal(kx, (batch, state_dim), dtype=jnp.float32)
    params = init_params(kp, state_dim, action_dim, hidden=32)

    out = jax.block_until_ready(actor_forward(x, params))
    ref = reference_forward(x, params)

    assert out.shape == (batch, action_dim)
    assert jnp.allclose(out, ref, atol=1e-5, rtol=1e-5)
    assert jnp.allclose(jnp.sum(out, axis=-1), 1.0, atol=1e-5)

    print("KERNEL_OK")
</pallas_src>

<mosaic_0001>
module attributes {stable_mosaic.version = 11 : i64} {
  func.func @actor_kernel(%arg0: i32, %arg1: memref<8x128xf32, #tpu.memory_space<vmem>>, %arg2: memref<128x256xf32, #tpu.memory_space<vmem>>, %arg3: memref<1x256xf32, #tpu.memory_space<vmem>>, %arg4: memref<256x256xf32, #tpu.memory_space<vmem>>, %arg5: memref<1x256xf32, #tpu.memory_space<vmem>>, %arg6: memref<256x64xf32, #tpu.memory_space<vmem>>, %arg7: memref<1x64xf32, #tpu.memory_space<vmem>>, %arg8: memref<8x64xf32, #tpu.memory_space<vmem>>) attributes {dimension_semantics = [#tpu.dimension_semantics<parallel>], iteration_bounds = array<i64: 1>, scalar_prefetch = 0 : i64, scratch_operands = 0 : i64, tpu.core_type = #tpu.core_type<tc>, window_params = [{transform_indices = @transform_0, window_bounds = array<i64: 8, 128>}, {pipeline_mode = #tpu.pipeline_mode<synchronous>, transform_indices = @transform_1, window_bounds = array<i64: 128, 256>}, {pipeline_mode = #tpu.pipeline_mode<synchronous>, transform_indices = @transform_2, window_bounds = array<i64: 1, 256>}, {pipeline_mode = #tpu.pipeline_mode<synchronous>, transform_indices = @transform_3, window_bounds = array<i64: 256, 256>}, {pipeline_mode = #tpu.pipeline_mode<synchronous>, transform_indices = @transform_4, window_bounds = array<i64: 1, 256>}, {pipeline_mode = #tpu.pipeline_mode<synchronous>, transform_indices = @transform_5, window_bounds = array<i64: 256, 64>}, {pipeline_mode = #tpu.pipeline_mode<synchronous>, transform_indices = @transform_6, window_bounds = array<i64: 1, 64>}, {transform_indices = @transform_7, window_bounds = array<i64: 8, 64>}]} {
    %c0 = arith.constant 0 : index
    %c0_0 = arith.constant 0 : index
    %0 = vector.load %arg1[%c0, %c0_0] : memref<8x128xf32, #tpu.memory_space<vmem>>, vector<8x128xf32>
    %c0_1 = arith.constant 0 : index
    %c0_2 = arith.constant 0 : index
    %1 = vector.load %arg2[%c0_1, %c0_2] : memref<128x256xf32, #tpu.memory_space<vmem>>, vector<128x256xf32>
    %cst = arith.constant dense<0.000000e+00> : vector<8x256xf32>
    %2 = tpu.matmul %0, %1, %cst {dimension_numbers = #tpu.dot_dimension_numbers<[1], [0], [0], [1], [0, 0, 1, 1], [], []>} : vector<8x128xf32>, vector<128x256xf32>, vector<8x256xf32> -> vector<8x256xf32>
    %c0_3 = arith.constant 0 : index
    %c0_4 = arith.constant 0 : index
    %3 = vector.load %arg3[%c0_3, %c0_4] : memref<1x256xf32, #tpu.memory_space<vmem>>, vector<1x256xf32>
    %4 = vector.broadcast %3 : vector<1x256xf32> to vector<8x256xf32>
    %5 = arith.addf %2, %4 : vector<8x256xf32>
    %cst_5 = arith.constant 0.000000e+00 : f32
    %6 = vector.broadcast %cst_5 : f32 to vector<8x256xf32>
    %7 = arith.maximumf %5, %6 : vector<8x256xf32>
    %c0_6 = arith.constant 0 : index
    %c0_7 = arith.constant 0 : index
    %8 = vector.load %arg4[%c0_6, %c0_7] : memref<256x256xf32, #tpu.memory_space<vmem>>, vector<256x256xf32>
    %cst_8 = arith.constant dense<0.000000e+00> : vector<8x256xf32>
    %9 = tpu.matmul %7, %8, %cst_8 {dimension_numbers = #tpu.dot_dimension_numbers<[1], [0], [0], [1], [0, 0, 1, 1], [], []>} : vector<8x256xf32>, vector<256x256xf32>, vector<8x256xf32> -> vector<8x256xf32>
    %c0_9 = arith.constant 0 : index
    %c0_10 = arith.constant 0 : index
    %10 = vector.load %arg5[%c0_9, %c0_10] : memref<1x256xf32, #tpu.memory_space<vmem>>, vector<1x256xf32>
    %11 = vector.broadcast %10 : vector<1x256xf32> to vector<8x256xf32>
    %12 = arith.addf %9, %11 : vector<8x256xf32>
    %cst_11 = arith.constant 0.000000e+00 : f32
    %13 = vector.broadcast %cst_11 : f32 to vector<8x256xf32>
    %14 = arith.maximumf %12, %13 : vector<8x256xf32>
    %c0_12 = arith.constant 0 : index
    %c0_13 = arith.constant 0 : index
    %15 = vector.load %arg6[%c0_12, %c0_13] : memref<256x64xf32, #tpu.memory_space<vmem>>, vector<256x64xf32>
    %cst_14 = arith.constant dense<0.000000e+00> : vector<8x64xf32>
    %16 = tpu.matmul %14, %15, %cst_14 {dimension_numbers = #tpu.dot_dimension_numbers<[1], [0], [0], [1], [0, 0, 1, 1], [], []>} : vector<8x256xf32>, vector<256x64xf32>, vector<8x64xf32> -> vector<8x64xf32>
    %c0_15 = arith.constant 0 : index
    %c0_16 = arith.constant 0 : index
    %17 = vector.load %arg7[%c0_15, %c0_16] : memref<1x64xf32, #tpu.memory_space<vmem>>, vector<1x64xf32>
    %18 = vector.broadcast %17 : vector<1x64xf32> to vector<8x64xf32>
    %19 = arith.addf %16, %18 : vector<8x64xf32>
    %20 = tpu.iota {dimensions = array<i32: 1>} : vector<8x64xi32>
    %c8_i32 = arith.constant 8 : i32
    %c0_i32 = arith.constant 0 : i32
    %21 = arith.cmpi eq, %c8_i32, %c0_i32 : i32
    %c1_i32 = arith.constant 1 : i32
    %22 = arith.select %21, %c1_i32, %c8_i32 : i32
    %23 = vector.broadcast %22 : i32 to vector<8x64xi32>
    %24 = arith.remsi %20, %23 : vector<8x64xi32>
    %c0_i32_17 = arith.constant 0 : i32
    %25 = vector.broadcast %c0_i32_17 : i32 to vector<8x64xi32>
    %26 = arith.cmpi ne, %24, %25 : vector<8x64xi32>
    %c0_i32_18 = arith.constant 0 : i32
    %27 = vector.broadcast %c0_i32_18 : i32 to vector<8x64xi32>
    %28 = arith.cmpi slt, %24, %27 : vector<8x64xi32>
    %c0_i32_19 = arith.constant 0 : i32
    %29 = arith.cmpi slt, %22, %c0_i32_19 : i32
    %30 = vector.broadcast %29 : i1 to vector<8x64xi1>
    %31 = vector.broadcast %30 : vector<8x64xi1> to vector<8x64xi1>
    %32 = arith.xori %28, %31 : vector<8x64xi1>
    %33 = arith.andi %32, %26 : vector<8x64xi1>
    %34 = vector.broadcast %22 : i32 to vector<8x64xi32>
    %35 = arith.addi %24, %34 : vector<8x64xi32>
    %36 = arith.select %33, %35, %24 : vector<8x64xi1>, vector<8x64xi32>
    %37 = vector.extract_strided_slice %19 {offsets = [0, 1], sizes = [8, 63], strides = [1, 1]} : vector<8x64xf32> to vector<8x63xf32>
    %38 = vector.extract_strided_slice %19 {offsets = [0, 0], sizes = [8, 1], strides = [1, 1]} : vector<8x64xf32> to vector<8x1xf32>
    %39 = tpu.concatenate %37, %38 in 1 : vector<8x63xf32>, vector<8x1xf32> -> vector<8x64xf32>
    %40 = vector.extract_strided_slice %19 {offsets = [0, 57], sizes = [8, 7], strides = [1, 1]} : vector<8x64xf32> to vector<8x7xf32>
    %41 = vector.extract_strided_slice %19 {offsets = [0, 0], sizes = [8, 57], strides = [1, 1]} : vector<8x64xf32> to vector<8x57xf32>
    %42 = tpu.concatenate %40, %41 in 1 : vector<8x7xf32>, vector<8x57xf32> -> vector<8x64xf32>
    %c7_i32 = arith.constant 7 : i32
    %43 = vector.broadcast %c7_i32 : i32 to vector<8x64xi32>
    %44 = arith.cmpi slt, %36, %43 : vector<8x64xi32>
    %45 = arith.select %44, %39, %42 : vector<8x64xi1>, vector<8x64xf32>
    %46 = arith.maximumf %19, %45 : vector<8x64xf32>
    %47 = vector.extract_strided_slice %46 {offsets = [0, 2], sizes = [8, 62], strides = [1, 1]} : vector<8x64xf32> to vector<8x62xf32>
    %48 = vector.extract_strided_slice %46 {offsets = [0, 0], sizes = [8, 2], strides = [1, 1]} : vector<8x64xf32> to vector<8x2xf32>
    %49 = tpu.concatenate %47, %48 in 1 : vector<8x62xf32>, vector<8x2xf32> -> vector<8x64xf32>
    %50 = vector.extract_strided_slice %46 {offsets = [0, 58], sizes = [8, 6], strides = [1, 1]} : vector<8x64xf32> to vector<8x6xf32>
    %51 = vector.extract_strided_slice %46 {offsets = [0, 0], sizes = [8, 58], strides = [1, 1]} : vector<8x64xf32> to vector<8x58xf32>
    %52 = tpu.concatenate %50, %51 in 1 : vector<8x6xf32>, vector<8x58xf32> -> vector<8x64xf32>
    %c6_i32 = arith.constant 6 : i32
    %53 = vector.broadcast %c6_i32 : i32 to vector<8x64xi32>
    %54 = arith.cmpi slt, %36, %53 : vector<8x64xi32>
    %55 = arith.select %54, %49, %52 : vector<8x64xi1>, vector<8x64xf32>
    %56 = arith.maximumf %46, %55 : vector<8x64xf32>
    %57 = vector.extract_strided_slice %56 {offsets = [0, 4], sizes = [8, 60], strides = [1, 1]} : vector<8x64xf32> to vector<8x60xf32>
    %58 = vector.extract_strided_slice %56 {offsets = [0, 0], sizes = [8, 4], strides = [1, 1]} : vector<8x64xf32> to vector<8x4xf32>
    %59 = tpu.concatenate %57, %58 in 1 : vector<8x60xf32>, vector<8x4xf32> -> vector<8x64xf32>
    %60 = vector.extract_strided_slice %56 {offsets = [0, 60], sizes = [8, 4], strides = [1, 1]} : vector<8x64xf32> to vector<8x4xf32>
    %61 = vector.extract_strided_slice %56 {offsets = [0, 0], sizes = [8, 60], strides = [1, 1]} : vector<8x64xf32> to vector<8x60xf32>
    %62 = tpu.concatenate %60, %61 in 1 : vector<8x4xf32>, vector<8x60xf32> -> vector<8x64xf32>
    %c4_i32 = arith.constant 4 : i32
    %63 = vector.broadcast %c4_i32 : i32 to vector<8x64xi32>
    %64 = arith.cmpi slt, %36, %63 : vector<8x64xi32>
    %65 = arith.select %64, %59, %62 : vector<8x64xi1>, vector<8x64xf32>
    %66 = arith.maximumf %56, %65 : vector<8x64xf32>
    %67 = arith.subf %19, %66 : vector<8x64xf32>
    %68 = math.exp %67 : vector<8x64xf32>
    %69 = vector.extract_strided_slice %68 {offsets = [0, 1], sizes = [8, 63], strides = [1, 1]} : vector<8x64xf32> to vector<8x63xf32>
    %70 = vector.extract_strided_slice %68 {offsets = [0, 0], sizes = [8, 1], strides = [1, 1]} : vector<8x64xf32> to vector<8x1xf32>
    %71 = tpu.concatenate %69, %70 in 1 : vector<8x63xf32>, vector<8x1xf32> -> vector<8x64xf32>
    %72 = vector.extract_strided_slice %68 {offsets = [0, 57], sizes = [8, 7], strides = [1, 1]} : vector<8x64xf32> to vector<8x7xf32>
    %73 = vector.extract_strided_slice %68 {offsets = [0, 0], sizes = [8, 57], strides = [1, 1]} : vector<8x64xf32> to vector<8x57xf32>
    %74 = tpu.concatenate %72, %73 in 1 : vector<8x7xf32>, vector<8x57xf32> -> vector<8x64xf32>
    %c7_i32_20 = arith.constant 7 : i32
    %75 = vector.broadcast %c7_i32_20 : i32 to vector<8x64xi32>
    %76 = arith.cmpi slt, %36, %75 : vector<8x64xi32>
    %77 = arith.select %76, %71, %74 : vector<8x64xi1>, vector<8x64xf32>
    %78 = arith.addf %68, %77 : vector<8x64xf32>
    %79 = vector.extract_strided_slice %78 {offsets = [0, 2], sizes = [8, 62], strides = [1, 1]} : vector<8x64xf32> to vector<8x62xf32>
    %80 = vector.extract_strided_slice %78 {offsets = [0, 0], sizes = [8, 2], strides = [1, 1]} : vector<8x64xf32> to vector<8x2xf32>
    %81 = tpu.concatenate %79, %80 in 1 : vector<8x62xf32>, vector<8x2xf32> -> vector<8x64xf32>
    %82 = vector.extract_strided_slice %78 {offsets = [0, 58], sizes = [8, 6], strides = [1, 1]} : vector<8x64xf32> to vector<8x6xf32>
    %83 = vector.extract_strided_slice %78 {offsets = [0, 0], sizes = [8, 58], strides = [1, 1]} : vector<8x64xf32> to vector<8x58xf32>
    %84 = tpu.concatenate %82, %83 in 1 : vector<8x6xf32>, vector<8x58xf32> -> vector<8x64xf32>
    %c6_i32_21 = arith.constant 6 : i32
    %85 = vector.broadcast %c6_i32_21 : i32 to vector<8x64xi32>
    %86 = arith.cmpi slt, %36, %85 : vector<8x64xi32>
    %87 = arith.select %86, %81, %84 : vector<8x64xi1>, vector<8x64xf32>
    %88 = arith.addf %78, %87 : vector<8x64xf32>
    %89 = vector.extract_strided_slice %88 {offsets = [0, 4], sizes = [8, 60], strides = [1, 1]} : vector<8x64xf32> to vector<8x60xf32>
    %90 = vector.extract_strided_slice %88 {offsets = [0, 0], sizes = [8, 4], strides = [1, 1]} : vector<8x64xf32> to vector<8x4xf32>
    %91 = tpu.concatenate %89, %90 in 1 : vector<8x60xf32>, vector<8x4xf32> -> vector<8x64xf32>
    %92 = vector.extract_strided_slice %88 {offsets = [0, 60], sizes = [8, 4], strides = [1, 1]} : vector<8x64xf32> to vector<8x4xf32>
    %93 = vector.extract_strided_slice %88 {offsets = [0, 0], sizes = [8, 60], strides = [1, 1]} : vector<8x64xf32> to vector<8x60xf32>
    %94 = tpu.concatenate %92, %93 in 1 : vector<8x4xf32>, vector<8x60xf32> -> vector<8x64xf32>
    %c4_i32_22 = arith.constant 4 : i32
    %95 = vector.broadcast %c4_i32_22 : i32 to vector<8x64xi32>
    %96 = arith.cmpi slt, %36, %95 : vector<8x64xi32>
    %97 = arith.select %96, %91, %94 : vector<8x64xi1>, vector<8x64xf32>
    %98 = arith.addf %88, %97 : vector<8x64xf32>
    %99 = tpu.reciprocal %98 {approx = true} : vector<8x64xf32> -> vector<8x64xf32>
    %100 = arith.mulf %98, %99 : vector<8x64xf32>
    %cst_23 = arith.constant 2.000000e+00 : f32
    %101 = vector.broadcast %cst_23 : f32 to vector<8x64xf32>
    %102 = arith.subf %101, %100 : vector<8x64xf32>
    %103 = arith.mulf %99, %102 : vector<8x64xf32>
    %104 = arith.mulf %68, %103 : vector<8x64xf32>
    %c0_24 = arith.constant 0 : index
    %c0_25 = arith.constant 0 : index
    %105 = vector.load %arg8[%c0_24, %c0_25] : memref<8x64xf32, #tpu.memory_space<vmem>>, vector<8x64xf32>
    tpu.vector_store %arg8[%c0_24, %c0_25], %104 {strides = array<i32>} : memref<8x64xf32, #tpu.memory_space<vmem>>, vector<8x64xf32>,
    return
  }
  func.func @transform_0(%arg0: i32) -> (i32, i32) {
    %c0_i32 = arith.constant 0 : i32
    %c0_i32_0 = arith.constant 0 : i32
    return %arg0, %c0_i32 : i32, i32
  }
  func.func @transform_1(%arg0: i32) -> (i32, i32) {
    %c0_i32 = arith.constant 0 : i32
    %c0_i32_0 = arith.constant 0 : i32
    %c0_i32_1 = arith.constant 0 : i32
    return %c0_i32, %c0_i32_0 : i32, i32
  }
  func.func @transform_2(%arg0: i32) -> (i32, i32) {
    %c0_i32 = arith.constant 0 : i32
    %c0_i32_0 = arith.constant 0 : i32
    %c0_i32_1 = arith.constant 0 : i32
    return %c0_i32, %c0_i32_0 : i32, i32
  }
  func.func @transform_3(%arg0: i32) -> (i32, i32) {
    %c0_i32 = arith.constant 0 : i32
    %c0_i32_0 = arith.constant 0 : i32
    %c0_i32_1 = arith.constant 0 : i32
    return %c0_i32, %c0_i32_0 : i32, i32
  }
  func.func @transform_4(%arg0: i32) -> (i32, i32) {
    %c0_i32 = arith.constant 0 : i32
    %c0_i32_0 = arith.constant 0 : i32
    %c0_i32_1 = arith.constant 0 : i32
    return %c0_i32, %c0_i32_0 : i32, i32
  }
  func.func @transform_5(%arg0: i32) -> (i32, i32) {
    %c0_i32 = arith.constant 0 : i32
    %c0_i32_0 = arith.constant 0 : i32
    %c0_i32_1 = arith.constant 0 : i32
    return %c0_i32, %c0_i32_0 : i32, i32
  }
  func.func @transform_6(%arg0: i32) -> (i32, i32) {
    %c0_i32 = arith.constant 0 : i32
    %c0_i32_0 = arith.constant 0 : i32
    %c0_i32_1 = arith.constant 0 : i32
    return %c0_i32, %c0_i32_0 : i32, i32
  }
  func.func @transform_7(%arg0: i32) -> (i32, i32) {
    %c0_i32 = arith.constant 0 : i32
    %c0_i32_0 = arith.constant 0 : i32
    return %arg0, %c0_i32 : i32, i32
  }
}

</mosaic_0001>

<bundles_post_ra>
// kernel: tpu_custom_call.1
= control target key start
LH: loop header
LB: loop body
LE: loop exit
PB: predicated region body
PF: predicated region fallthrough
CT: control target
= control target key end

     0   :  { %12 = vsyncpa [#allocation3], 0  ;;  %s896_s0 = inlined_call_operand.vmem [shape: f32[8,128], index: 0, kind: input, shape index: {}]   ;;  %s897_s1 = inlined_call_operand.vmem [shape: f32[128,256], index: 1, kind: input, shape index: {}]   ;;  %s898_s2 = inlined_call_operand.vmem [shape: f32[1,256], index: 2, kind: input, shape index: {}]   ;;  %s899_s3 = inlined_call_operand.hbm [shape: f32[256,256], index: 3, kind: input, shape index: {}]   ;;  %s900_s4 = inlined_call_operand.vmem [shape: f32[1,256], index: 4, kind: input, shape index: {}]   ;;  %s901_s5 = inlined_call_operand.vmem [shape: f32[256,64], index: 5, kind: input, shape index: {}]   ;;  %s902_s6 = inlined_call_operand.vmem [shape: f32[1,64], index: 6, kind: input, shape index: {}]   ;;  %s903_s7 = inlined_call_operand.hbm [shape: f32[8,64], index: 7, kind: output, shape index: {}]  }
   0x1   :  { %13 = vsyncpa [#allocation4], 0  ;;  %s24_s26 = sshll.u32 %s899_s3, 4  ;;  %s577_s27 = smov [#allocation2]   ;;  %s25_s26 = int_to_ptr.hbm [resolvable:$true] %s24_s26 }
   0x2   :  { %s26_s28 = sshll.u32 %s577_s27, 4  ;;  %s578_s29 = smov 256   ;;  %s27_s28 = int_to_ptr.vmem [resolvable:$true] %s26_s28 }
   0x3   :  { %s579_s30 = smov 16  }
   0x4   :  { %32 = dma.hbm_to_vmem [thread:$0]  %s25_s26, 8192, %s27_s28, [#allocation3], %s578_s29, %s578_s29, %s579_s30  }
   0x5   :  { %573 = dma.done.wait [#allocation3], 8192  }
   0x6   :  { %574 = vsyncadd [#allocation3], 4294959104  ;;  %v74_v0 = vld [vmem:[%s897_s1 + $0xf0] sm:$0xff]  ;;  %v72_v1 = vld [vmem:[%s897_s1 + $0xe0] sm:$0xff]  ;;  %s581_s15 = smov 127   ;;  %s582_s16 = smov 7  }
   0x7   :  { %v75_v2 = vld [vmem:[%s897_s1 + $0xf8] sm:$0xff]  ;;  %82 = vmatpush.msra.mxu0 %v74_v0  ;;  %v73_v3 = vld [vmem:[%s897_s1 + $0xe8] sm:$0xff]  ;;  %v70_v4 = vld [vmem:[%s897_s1 + $0xd0] sm:$0xff]  ;;  %s583_s17 = smov 63   ;;  %vm381_vm0 = vcmask 56320   ;;  %vm373_vm1 = vcmask 515072  }
   0x8   :  { %102 = vmatpush.msra.mxu1 %v75_v2  ;;  %v71_v5 = vld [vmem:[%s897_s1 + $0xd8] sm:$0xff]  ;;  %v68_v6 = vld [vmem:[%s897_s1 + $0xc0] sm:$0xff]  ;;  %v69_v7 = vld [vmem:[%s897_s1 + $0xc8] sm:$0xff]  ;;  %s586_s18 = smov 126   ;;  %s587_s19 = smov 62   ;;  %vm393_vm3 = vcmask 506880  }
   0x9   :  { %83 = vmatpush.msra.mxu0 %v72_v1  ;;  %v66_v8 = vld [vmem:[%s897_s1 + $0xb0] sm:$0xff]  ;;  %v67_v9 = vld [vmem:[%s897_s1 + $0xb8] sm:$0xff]  ;;  %v64_v10 = vld [vmem:[%s897_s1 + $0xa0] sm:$0xff]  ;;  %vm401_vm4 = vcmask 48128   ;;  %s588_s20 = smov 68   ;;  %s589_s21 = smov 60  }
   0xa   :  { %103 = vmatpush.msra.mxu1 %v73_v3  ;;  %v65_v11 = vld [vmem:[%s897_s1 + $0xa8] sm:$0xff]  ;;  %v62_v12 = vld [vmem:[%s897_s1 + $0x90] sm:$0xff]  ;;  %v63_v13 = vld [vmem:[%s897_s1 + $0x98] sm:$0xff]  ;;  %s590_s22 = smov 124   ;;  %s591_s23 = smov 4   ;;  %vm421_vm6 = vcmask 31744  }
   0xb   :  { %84 = vmatpush.msra.mxu0 %v70_v4  ;;  %v154_v14 = vld [vmem:[#allocation2 + $0xf0] sm:$0xff]  ;;  %v152_v15 = vld [vmem:[#allocation2 + $0xe0] sm:$0xff]  ;;  %v61_v17 = vld [vmem:[%s897_s1 + $0x88] sm:$0xff]  ;;  %vm413_vm7 = vcmask 490496   ;;  %s592_s24 = smov [#allocation5]   ;;  %s494_s26 = sshll.u32 %s903_s7, 4  ;;  %s495_s26 = int_to_ptr.hbm [resolvable:$true] %s494_s26 }
   0xc   :  { %104 = vmatpush.msra.mxu1 %v71_v5  ;;  %v60_v16 = vld [vmem:[%s897_s1 + $0x80] sm:$0xff]  ;;  %194 = vmatpush.msra.mxu2 %v154_v14  ;;  %v186_v18 = vld [vmem:[#allocation2 + $0x1f0] sm:$0xff]  ;;  %v59_v22 = vld [vmem:[%s897_s1 + $0x78] sm:$0xff]  ;;  %vm485_vm9 = vcmask 523264  }
   0xd   :  { %85 = vmatpush.msra.mxu0 %v68_v6  ;;  %v150_v19 = vld [vmem:[#allocation2 + $0xd0] sm:$0xff]  ;;  %v184_v20 = vld [vmem:[#allocation2 + $0x1e0] sm:$0xff]  ;;  %214 = vmatpush.msra.mxu3 %v186_v18  ;;  %v57_v26 = vld [vmem:[%s897_s1 + $0x68] sm:$0xff] }
   0xe   :  { %105 = vmatpush.msra.mxu1 %v69_v7  ;;  %v58_v21 = vld [vmem:[%s897_s1 + $0x70] sm:$0xff]  ;;  %195 = vmatpush.msra.mxu2 %v152_v15  ;;  %v148_v23 = vld [vmem:[#allocation2 + $0xc0] sm:$0xff]  ;;  %v55_v30 = vld [vmem:[%s897_s1 + $0x58] sm:$0xff] }
   0xf   :  { %86 = vmatpush.msra.mxu0 %v66_v8  ;;  %v182_v24 = vld [vmem:[#allocation2 + $0x1d0] sm:$0xff]  ;;  %v56_v25 = vld [vmem:[%s897_s1 + $0x60] sm:$0xff]  ;;  %215 = vmatpush.msra.mxu3 %v184_v20  ;;  %v53_v34 = vld [vmem:[%s897_s1 + $0x48] sm:$0xff] }
  0x10   :  { %106 = vmatpush.msra.mxu1 %v67_v9  ;;  %196 = vmatpush.msra.mxu2 %v150_v19  ;;  %v146_v27 = vld [vmem:[#allocation2 + $0xb0] sm:$0xff]  ;;  %v180_v28 = vld [vmem:[#allocation2 + $0x1c0] sm:$0xff]  ;;  %v51_v38 = vld [vmem:[%s897_s1 + $0x38] sm:$0xff] }
  0x11   :  { %87 = vmatpush.msra.mxu0 %v64_v10  ;;  %v54_v29 = vld [vmem:[%s897_s1 + $0x50] sm:$0xff]  ;;  %216 = vmatpush.msra.mxu3 %v182_v24  ;;  %v144_v31 = vld [vmem:[#allocation2 + $0xa0] sm:$0xff]  ;;  %v49_v42 = vld [vmem:[%s897_s1 + $0x28] sm:$0xff] }
  0x12   :  { %107 = vmatpush.msra.mxu1 %v65_v11  ;;  %197 = vmatpush.msra.mxu2 %v148_v23  ;;  %v178_v32 = vld [vmem:[#allocation2 + $0x1b0] sm:$0xff]  ;;  %v52_v33 = vld [vmem:[%s897_s1 + $0x40] sm:$0xff]  ;;  %v47_v46 = vld [vmem:[%s897_s1 + $0x18] sm:$0xff] }
  0x13   :  { %88 = vmatpush.msra.mxu0 %v62_v12  ;;  %217 = vmatpush.msra.mxu3 %v180_v28  ;;  %v142_v35 = vld [vmem:[#allocation2 + $0x90] sm:$0xff]  ;;  %v176_v36 = vld [vmem:[#allocation2 + $0x1a0] sm:$0xff]  ;;  %v45_v50 = vld [vmem:[%s897_s1 + $0x8] sm:$0xff] }
  0x14   :  { %108 = vmatpush.msra.mxu1 %v63_v13  ;;  %198 = vmatpush.msra.mxu2 %v146_v27  ;;  %v50_v37 = vld [vmem:[%s897_s1 + $0x30] sm:$0xff]  ;;  %v140_v39 = vld [vmem:[#allocation2 + $0x80] sm:$0xff]  ;;  %v155_v52 = vld [vmem:[#allocation2 + $0xf8] sm:$0xff] }
  0x15   :  { %89 = vmatpush.msra.mxu0 %v60_v16  ;;  %218 = vmatpush.msra.mxu3 %v178_v32  ;;  %v174_v40 = vld [vmem:[#allocation2 + $0x190] sm:$0xff]  ;;  %v48_v41 = vld [vmem:[%s897_s1 + $0x20] sm:$0xff]  ;;  %v187_v53 = vld [vmem:[#allocation2 + $0x1f8] sm:$0xff] }
  0x16   :  { %109 = vmatpush.msra.mxu1 %v61_v17  ;;  %199 = vmatpush.msra.mxu2 %v144_v31  ;;  %v138_v43 = vld [vmem:[#allocation2 + $0x70] sm:$0xff]  ;;  %v172_v44 = vld [vmem:[#allocation2 + $0x180] sm:$0xff]  ;;  %v153_v56 = vld [vmem:[#allocation2 + $0xe8] sm:$0xff] }
  0x17   :  { %90 = vmatpush.msra.mxu0 %v58_v21  ;;  %219 = vmatpush.msra.mxu3 %v176_v36  ;;  %v46_v45 = vld [vmem:[%s897_s1 + $0x10] sm:$0xff]  ;;  %v136_v47 = vld [vmem:[#allocation2 + $0x60] sm:$0xff]  ;;  %v185_v57 = vld [vmem:[#allocation2 + $0x1e8] sm:$0xff] }
  0x18   :  { %110 = vmatpush.msra.mxu1 %v59_v22  ;;  %200 = vmatpush.msra.mxu2 %v142_v35  ;;  %v170_v48 = vld [vmem:[#allocation2 + $0x170] sm:$0xff]  ;;  %v44_v49 = vld [vmem:[%s897_s1] sm:$0xff]  ;;  %v151_v60 = vld [vmem:[#allocation2 + $0xd8] sm:$0xff] }
  0x19   :  { %91 = vmatpush.msra.mxu0 %v56_v25  ;;  %220 = vmatpush.msra.mxu3 %v174_v40  ;;  %v43_v51 = vld [vmem:[%s896_s0] sm:$0xff]  ;;  %v134_v54 = vld [vmem:[#allocation2 + $0x50] sm:$0xff]  ;;  %v183_v61 = vld [vmem:[#allocation2 + $0x1d8] sm:$0xff]  ;;  %s492_s0 = sshll.u32 %s592_s24, 4  ;;  %s493_s0 = int_to_ptr.vmem [resolvable:$true] %s492_s0 }
  0x1a   :  { %111 = vmatpush.msra.mxu1 %v57_v26  ;;  %201 = vmatpush.msra.mxu2 %v140_v39  ;;  %v168_v55 = vld [vmem:[#allocation2 + $0x160] sm:$0xff]  ;;  %v166_v59 = vld [vmem:[#allocation2 + $0x150] sm:$0xff]  ;;  %v149_v0 = vld [vmem:[#allocation2 + $0xc8] sm:$0xff] }
  0x1b   :  { %92 = vmatpush.msra.mxu0 %v54_v29  ;;  %221 = vmatpush.msra.mxu3 %v172_v44  ;;  %v132_v58 = vld [vmem:[#allocation2 + $0x40] sm:$0xff]  ;;  %v130_v62 = vld [vmem:[#allocation2 + $0x30] sm:$0xff]  ;;  %v181_v1 = vld [vmem:[#allocation2 + $0x1c8] sm:$0xff] }
  0x1c   :  { %112 = vmatpush.msra.mxu1 %v55_v30  ;;  %202 = vmatpush.msra.mxu2 %v138_v43  ;;  %v164_v63 = vld [vmem:[#allocation2 + $0x140] sm:$0xff]  ;;  %v147_v2 = vld [vmem:[#allocation2 + $0xb8] sm:$0xff]  ;;  %v145_v4 = vld [vmem:[#allocation2 + $0xa8] sm:$0xff] }
  0x1d   :  { %93 = vmatpush.msra.mxu0 %v52_v33  ;;  %222 = vmatpush.msra.mxu3 %v170_v48  ;;  %v179_v3 = vld [vmem:[#allocation2 + $0x1b8] sm:$0xff]  ;;  %v177_v5 = vld [vmem:[#allocation2 + $0x1a8] sm:$0xff]  ;;  %v128_v19 = vld [vmem:[#allocation2 + $0x20] sm:$0xff] }
  0x1e   :  { %113 = vmatpush.msra.mxu1 %v53_v34  ;;  %203 = vmatpush.msra.mxu2 %v136_v47  ;;  %v143_v6 = vld [vmem:[#allocation2 + $0x98] sm:$0xff]  ;;  %v141_v8 = vld [vmem:[#allocation2 + $0x88] sm:$0xff]  ;;  %v162_v20 = vld [vmem:[#allocation2 + $0x130] sm:$0xff] }
  0x1f   :  { %94 = vmatpush.msra.mxu0 %v50_v37  ;;  %223 = vmatpush.msra.mxu3 %v168_v55  ;;  %v175_v7 = vld [vmem:[#allocation2 + $0x198] sm:$0xff]  ;;  %v173_v9 = vld [vmem:[#allocation2 + $0x188] sm:$0xff]  ;;  %v126_v23 = vld [vmem:[#allocation2 + $0x10] sm:$0xff] }
  0x20   :  { %114 = vmatpush.msra.mxu1 %v51_v38  ;;  %204 = vmatpush.msra.mxu2 %v134_v54  ;;  %v139_v10 = vld [vmem:[#allocation2 + $0x78] sm:$0xff]  ;;  %v137_v12 = vld [vmem:[#allocation2 + $0x68] sm:$0xff]  ;;  %v160_v24 = vld [vmem:[#allocation2 + $0x120] sm:$0xff] }
  0x21   :  { %95 = vmatpush.msra.mxu0 %v48_v41  ;;  %224 = vmatpush.msra.mxu3 %v166_v59  ;;  %v171_v11 = vld [vmem:[#allocation2 + $0x178] sm:$0xff]  ;;  %v169_v13 = vld [vmem:[#allocation2 + $0x168] sm:$0xff]  ;;  %v124_v27 = vld [vmem:[#allocation2] sm:$0xff] }
  0x22   :  { %115 = vmatpush.msra.mxu1 %v49_v42  ;;  %205 = vmatpush.msra.mxu2 %v132_v58  ;;  %v135_v14 = vld [vmem:[#allocation2 + $0x58] sm:$0xff]  ;;  %v133_v16 = vld [vmem:[#allocation2 + $0x48] sm:$0xff]  ;;  %v158_v28 = vld [vmem:[#allocation2 + $0x110] sm:$0xff] }
  0x23   :  { %96 = vmatpush.msra.mxu0 %v46_v45  ;;  %225 = vmatpush.msra.mxu3 %v164_v63  ;;  %v167_v15 = vld [vmem:[#allocation2 + $0x158] sm:$0xff]  ;;  %v165_v17 = vld [vmem:[#allocation2 + $0x148] sm:$0xff]  ;;  %v156_v31 = vld [vmem:[#allocation2 + $0x100] sm:$0xff] }
  0x24   :  { %116 = vmatpush.msra.mxu1 %v47_v46  ;;  %206 = vmatpush.msra.mxu2 %v130_v62  ;;  %v131_v18 = vld [vmem:[#allocation2 + $0x38] sm:$0xff]  ;;  %v129_v21 = vld [vmem:[#allocation2 + $0x28] sm:$0xff]  ;;  %v306_v34 = vld [vmem:[%s901_s5 + $0xf0] sm:$0xff] }
  0x25   :  { %97 = vmatpush.msra.mxu0 %v44_v49  ;;  %226 = vmatpush.msra.mxu3 %v162_v20  ;;  %v163_v22 = vld [vmem:[#allocation2 + $0x138] sm:$0xff]  ;;  %v161_v26 = vld [vmem:[#allocation2 + $0x128] sm:$0xff]  ;;  %v290_v36 = vld [vmem:[%s901_s5 + $0x70] sm:$0xff] }
  0x26   :  { %117 = vmatpush.msra.mxu1 %v45_v50  ;;  %98 = vmatmul.f32.vlgmr.msra.gmra.mxu0 %v43_v51  ;;  %v127_v25 = vld [vmem:[#allocation2 + $0x18] sm:$0xff]  ;;  %v125_v29 = vld [vmem:[#allocation2 + $0x8] sm:$0xff]  ;;  %v304_v39 = vld [vmem:[%s901_s5 + $0xe0] sm:$0xff] }
  0x27   :  { %118 = vmatmul.f32.vlgmr.msra.gmra.mxu1 %v43_v51  ;;  %234 = vmatpush.msrb.mxu0 %v155_v52  ;;  %v159_v30 = vld [vmem:[#allocation2 + $0x118] sm:$0xff]  ;;  %v157_v32 = vld [vmem:[#allocation2 + $0x108] sm:$0xff]  ;;  %v288_v40 = vld [vmem:[%s901_s5 + $0x60] sm:$0xff] }
  0x28   :  { %254 = vmatpush.msrb.mxu1 %v187_v53  ;;  %207 = vmatpush.msra.mxu2 %v128_v19  ;;  %v307_v33 = vld [vmem:[%s901_s5 + $0xf8] sm:$0xff]  ;;  %v305_v37 = vld [vmem:[%s901_s5 + $0xe8] sm:$0xff]  ;;  %v302_v43 = vld [vmem:[%s901_s5 + $0xd0] sm:$0xff] }
  0x29   :  { %235 = vmatpush.msrb.mxu0 %v153_v56  ;;  %227 = vmatpush.msra.mxu3 %v160_v24  ;;  %v291_v35 = vld [vmem:[%s901_s5 + $0x78] sm:$0xff]  ;;  %v289_v38 = vld [vmem:[%s901_s5 + $0x68] sm:$0xff]  ;;  %v286_v44 = vld [vmem:[%s901_s5 + $0x50] sm:$0xff] }
  0x2a   :  { %255 = vmatpush.msrb.mxu1 %v185_v57  ;;  %208 = vmatpush.msra.mxu2 %v126_v23  ;;  %v303_v41 = vld [vmem:[%s901_s5 + $0xd8] sm:$0xff]  ;;  %v301_v45 = vld [vmem:[%s901_s5 + $0xc8] sm:$0xff]  ;;  %v300_v47 = vld [vmem:[%s901_s5 + $0xc0] sm:$0xff] }
  0x2b   :  { %236 = vmatpush.msrb.mxu0 %v151_v60  ;;  %228 = vmatpush.msra.mxu3 %v158_v28  ;;  %v287_v42 = vld [vmem:[%s901_s5 + $0x58] sm:$0xff]  ;;  %v285_v46 = vld [vmem:[%s901_s5 + $0x48] sm:$0xff]  ;;  %v284_v48 = vld [vmem:[%s901_s5 + $0x40] sm:$0xff]  ;;  %v352_v28 = vlaneseq }
  0x2c   :  { %256 = vmatpush.msrb.mxu1 %v183_v61  ;;  %209 = vmatpush.msra.mxu2 %v124_v27  ;;  %v299_v49 = vld [vmem:[%s901_s5 + $0xb8] sm:$0xff]  ;;  %v298_v51 = vld [vmem:[%s901_s5 + $0xb0] sm:$0xff]  ;;  %v297_v52 = vld [vmem:[%s901_s5 + $0xa8] sm:$0xff] }
  0x2d   :  { %237 = vmatpush.msrb.mxu0 %v149_v0  ;;  %229 = vmatpush.msra.mxu3 %v156_v31  ;;  %v283_v50 = vld [vmem:[%s901_s5 + $0x38] sm:$0xff]  ;;  %v76_v53 = vld [vmem:[%s898_s2] sm:$0x3]  ;;  %v282_v63 = vld [vmem:[%s901_s5 + $0x30] sm:$0xff]  ;;  %s585_s2 = smov 70  }
  0x2e   :  { %257 = vmatpush.msrb.mxu1 %v181_v1  ;;  %312 = vmatpush.msrb.mxu2 %v291_v35  ;;  %v296_v54 = vld [vmem:[%s901_s5 + $0xa0] sm:$0xff]  ;;  %v78_v55 = vperm.slane %v76_v53, 0  ;;  %v79_v56 = vperm.slane %v76_v53, 1  ;;  %v295_v0 = vld [vmem:[%s901_s5 + $0x98] sm:$0xff]  ;;  %v281_v1 = vld [vmem:[%s901_s5 + $0x28] sm:$0xff] }
  0x2f   :  { %238 = vmatpush.msrb.mxu0 %v147_v2  ;;  %332 = vmatpush.msrb.mxu3 %v307_v33  ;;  %v294_v2 = vld [vmem:[%s901_s5 + $0x90] sm:$0xff]  ;;  %v520_v23 = vld [vmem:[%s902_s6] ss:$0 sm:$0xff]  ;;  %s584_s6 = smov 6  }
  0x30   :  { %258 = vmatpush.msrb.mxu1 %v179_v3  ;;  %313 = vmatpush.msrb.mxu2 %v290_v36  ;;  %v280_v3 = vld [vmem:[%s901_s5 + $0x20] sm:$0xff] }
  0x31   :  { %239 = vmatpush.msrb.mxu0 %v145_v4  ;;  %333 = vmatpush.msrb.mxu3 %v306_v34  ;;  %v293_v4 = vld [vmem:[%s901_s5 + $0x88] sm:$0xff] }
  0x32   :  { %259 = vmatpush.msrb.mxu1 %v177_v5  ;;  %314 = vmatpush.msrb.mxu2 %v289_v38  ;;  %v279_v5 = vld [vmem:[%s901_s5 + $0x18] sm:$0xff] }
  0x33   :  { %240 = vmatpush.msrb.mxu0 %v143_v6  ;;  %334 = vmatpush.msrb.mxu3 %v305_v37  ;;  %v292_v6 = vld [vmem:[%s901_s5 + $0x80] sm:$0xff] }
  0x34   :  { %260 = vmatpush.msrb.mxu1 %v175_v7  ;;  %315 = vmatpush.msrb.mxu2 %v288_v40  ;;  %v278_v7 = vld [vmem:[%s901_s5 + $0x10] sm:$0xff] }
  0x35   :  { %241 = vmatpush.msrb.mxu0 %v141_v8  ;;  %335 = vmatpush.msrb.mxu3 %v304_v39  ;;  %v277_v8 = vld [vmem:[%s901_s5 + $0x8] sm:$0xff] }
  0x36   :  { %261 = vmatpush.msrb.mxu1 %v173_v9  ;;  %316 = vmatpush.msrb.mxu2 %v287_v42  ;;  %v276_v9 = vld [vmem:[%s901_s5] sm:$0xff] }
  0x37   :  { %242 = vmatpush.msrb.mxu0 %v139_v10  ;;  %336 = vmatpush.msrb.mxu3 %v303_v41  ;;  %v188_v10 = vld [vmem:[%s900_s4] sm:$0x3]  ;;  %s580_s4 = smov 71  }
  0x38   :  { %262 = vmatpush.msrb.mxu1 %v171_v11  ;;  %317 = vmatpush.msrb.mxu2 %v286_v44  ;;  %v191_v11 = vperm.slane %v188_v10, 1 }
  0x39   :  { %243 = vmatpush.msrb.mxu0 %v137_v12  ;;  %337 = vmatpush.msrb.mxu3 %v302_v43 }
  0x3a   :  { %263 = vmatpush.msrb.mxu1 %v169_v13  ;;  %318 = vmatpush.msrb.mxu2 %v285_v46 }
  0x3b   :  { %244 = vmatpush.msrb.mxu0 %v135_v14  ;;  %338 = vmatpush.msrb.mxu3 %v301_v45 }
  0x3c   :  { %264 = vmatpush.msrb.mxu1 %v167_v15  ;;  %319 = vmatpush.msrb.mxu2 %v284_v48 }
  0x3d   :  { %245 = vmatpush.msrb.mxu0 %v133_v16  ;;  %339 = vmatpush.msrb.mxu3 %v300_v47  ;;  %v190_v16 = vperm.slane %v188_v10, 0 }
  0x3e   :  { %265 = vmatpush.msrb.mxu1 %v165_v17  ;;  %320 = vmatpush.msrb.mxu2 %v283_v50 }
  0x3f   :  { %246 = vmatpush.msrb.mxu0 %v131_v18  ;;  %340 = vmatpush.msrb.mxu3 %v299_v49 }
  0x40   :  { %266 = vmatpush.msrb.mxu1 %v163_v22  ;;  %321 = vmatpush.msrb.mxu2 %v282_v63 }
  0x41   :  { %247 = vmatpush.msrb.mxu0 %v129_v21  ;;  %341 = vmatpush.msrb.mxu3 %v298_v51 }
  0x42   :  { %267 = vmatpush.msrb.mxu1 %v161_v26  ;;  %322 = vmatpush.msrb.mxu2 %v281_v1 }
  0x43   :  { %248 = vmatpush.msrb.mxu0 %v127_v25  ;;  %342 = vmatpush.msrb.mxu3 %v297_v52 }
  0x44   :  { %268 = vmatpush.msrb.mxu1 %v159_v30  ;;  %323 = vmatpush.msrb.mxu2 %v280_v3 }
  0x45   :  { %249 = vmatpush.msrb.mxu0 %v125_v29  ;;  %343 = vmatpush.msrb.mxu3 %v296_v54  ;;  %v353_v29 = vand.u32 127, %v352_v28 }
  0x46   :  { %269 = vmatpush.msrb.mxu1 %v157_v32  ;;  %324 = vmatpush.msrb.mxu2 %v279_v5 }
  0x47   :  { %344 = vmatpush.msrb.mxu3 %v295_v0  ;;  %v844_v32 = vand.u32 7, %v353_v29 }
  0x48   :  { %325 = vmatpush.msrb.mxu2 %v278_v7 }
  0x49   :  { %345 = vmatpush.msrb.mxu3 %v294_v2  ;;  %vm383_vm2 = vcmp.lt.s32.totalorder %v844_v32, 7  ;;  %vm403_vm5 = vcmp.lt.s32.totalorder %v844_v32, 6  ;;  %vm423_vm8 = vcmp.lt.s32.totalorder %v844_v32, 4 }
  0x4a   :  { %326 = vmatpush.msrb.mxu2 %v277_v8 }
  0x4b   :  { %346 = vmatpush.msrb.mxu3 %v293_v4 }
  0x4c   :  { %327 = vmatpush.msrb.mxu2 %v276_v9 }
  0x4d   :  { %347 = vmatpush.msrb.mxu3 %v292_v6 }
  0xa3   :  { %v99_v57 = vpop.f32.mrf.mxu0 }
  0xa4   :  { %v119_v58 = vpop.f32.mrf.mxu1  ;;  %v100_v59 = vadd.f32 %v99_v57, %v78_v55 }
  0xa5   :  { %v120_v60 = vadd.f32 %v119_v58, %v79_v56 }
  0xa6   :  { %v122_v61 = vmax.f32 %v100_v59, 0.0 }
  0xa7   :  { %v123_v62 = vmax.f32 %v120_v60, 0.0 }
  0xa8   :  { %210 = vmatmul.f32.vlgmr.msra.gmra.mxu2 %v122_v61  ;;  %250 = vmatmul.f32.vlgmr.msrb.gmra.mxu0 %v122_v61 }
  0xa9   :  { %230 = vmatmul.f32.vlgmr.msra.gmra.mxu3 %v123_v62  ;;  %270 = vmatmul.f32.vlgmr.msrb.gmra.mxu1 %v123_v62 }
 0x125   :  { %v251_v12 = vpop.f32.mrf.mxu0 }
 0x126   :  { %v252_v13 = vadd.f32 %v251_v12, %v191_v11  ;;  %v271_v14 = vpop.f32.mrf.mxu1 }
 0x128   :  { %v272_v15 = vadd.f32 %v271_v14, %v252_v13 }
 0x12a   :  { %v275_v17 = vmax.f32 %v272_v15, 0.0 }
 0x12b   :  { %v211_v18 = vpop.f32.mrf.mxu2 }
 0x12c   :  { %v212_v19 = vadd.f32 %v211_v18, %v190_v16  ;;  %348 = vmatmul.f32.vlgmr.msrb.gmra.mxu3 %v275_v17  ;;  %v231_v20 = vpop.f32.mrf.mxu3 }
 0x12e   :  { %v232_v21 = vadd.f32 %v231_v20, %v212_v19 }
 0x130   :  { %v274_v22 = vmax.f32 %v232_v21, 0.0 }
 0x132   :  { %328 = vmatmul.f32.vlgmr.msrb.gmra.mxu2 %v274_v22 }
 0x1af   :  { %v349_v26 = vpop.f32.mrf.mxu3 }
 0x1b5   :  { %v329_v24 = vpop.f32.mrf.mxu2 }
 0x1b6   :  { %v330_v25 = vadd.f32 %v520_v23, %v329_v24 }
 0x1b8   :  { %v350_v27 = vadd.f32 %v349_v26, %v330_v25 }
 0x1ba   :  { %375 = vrot.lane.b32.xlu1 %v350_v27, %s580_s4  ;;  %367 = vrot.lane.b32.xlu0 %v350_v27, %s581_s15 }
 0x1c2   :  { %378 = vrot.lane.b32.xlu1 %v350_v27, %s582_s16  ;;  %370 = vrot.lane.b32.xlu0 %v350_v27, %s583_s17 }
 0x22c   :  { %v376_v30 = vpop.permute.xlu1 %375  ;;  %v368_v31 = vpop.permute.xlu0 %367 }
 0x234   :  { %v379_v33 = vpop.permute.xlu1 %378  ;;  %v371_v34 = vpop.permute.xlu0 %370 }
 0x235   :  { %v382_v35 = vsel %vm381_vm0, %v376_v30, %v379_v33  ;;  %v374_v36 = vsel %vm373_vm1, %v368_v31, %v371_v34 }
 0x236   :  { %v384_v37 = vsel %vm383_vm2, %v374_v36, %v382_v35 }
 0x237   :  { %v385_v38 = vmax.f32 %v350_v27, %v384_v37 }
 0x239   :  { %398 = vrot.lane.b32.xlu1 %v385_v38, %s584_s6  ;;  %395 = vrot.lane.b32.xlu0 %v385_v38, %s585_s2 }
 0x23a   :  { %387 = vrot.lane.b32.xlu2 %v385_v38, %s586_s18 }
 0x242   :  { %390 = vrot.lane.b32.xlu2 %v385_v38, %s587_s19 }
 0x294   :  { %v388_v39 = vpop.permute.xlu2 %387 }
 0x29c   :  { %v391_v40 = vpop.permute.xlu2 %390 }
 0x29d   :  { %v394_v43 = vsel %vm393_vm3, %v388_v39, %v391_v40 }
 0x2ab   :  { %v399_v41 = vpop.permute.xlu1 %398  ;;  %v396_v42 = vpop.permute.xlu0 %395 }
 0x2ac   :  { %v402_v44 = vsel %vm401_vm4, %v396_v42, %v399_v41 }
 0x2ad   :  { %v404_v45 = vsel %vm403_vm5, %v394_v43, %v402_v44 }
 0x2ae   :  { %v405_v46 = vmax.f32 %v385_v38, %v404_v45 }
 0x2b0   :  { %415 = vrot.lane.b32.xlu1 %v405_v46, %s588_s20  ;;  %410 = vrot.lane.b32.xlu0 %v405_v46, %s589_s21 }
 0x2b1   :  { %407 = vrot.lane.b32.xlu2 %v405_v46, %s590_s22 }
 0x2b9   :  { %418 = vrot.lane.b32.xlu2 %v405_v46, %s591_s23 }
 0x30b   :  { %v408_v47 = vpop.permute.xlu2 %407 }
 0x313   :  { %v419_v48 = vpop.permute.xlu2 %418 }
 0x322   :  { %v416_v49 = vpop.permute.xlu1 %415  ;;  %v411_v50 = vpop.permute.xlu0 %410 }
 0x323   :  { %v422_v51 = vsel %vm421_vm6, %v416_v49, %v419_v48  ;;  %v414_v52 = vsel %vm413_vm7, %v408_v47, %v411_v50 }
 0x324   :  { %v424_v53 = vsel %vm423_vm8, %v414_v52, %v422_v51 }
 0x325   :  { %v425_v54 = vmax.f32 %v405_v46, %v424_v53 }
 0x327   :  { %v426_v55 = vsub.f32 %v350_v27, %v425_v54 }
 0x329   :  { %v427_v56 = vmul.f32 1.442695, %v426_v55 }
 0x32b   :  { %521 = vpow2.f32 %v427_v56 }
 0x331   :  { %v522_v57 = vpop.eup %521 }
 0x332   :  { %437 = vrot.lane.b32.xlu2 %v522_v57, %s580_s4  ;;  %433 = vrot.lane.b32.xlu1 %v522_v57, %s583_s17 }
 0x333   :  { %430 = vrot.lane.b32.xlu0 %v522_v57, %s581_s15 }
 0x33b   :  { %440 = vrot.lane.b32.xlu0 %v522_v57, %s582_s16 }
 0x38c   :  { %v438_v60 = vpop.permute.xlu2 %437 }
 0x3a4   :  { %v434_v59 = vpop.permute.xlu1 %433 }
 0x3a5   :  { %v431_v58 = vpop.permute.xlu0 %430 }
 0x3a6   :  { %v436_v62 = vsel %vm373_vm1, %v431_v58, %v434_v59 }
 0x3ad   :  { %v441_v61 = vpop.permute.xlu0 %440 }
 0x3ae   :  { %v443_v63 = vsel %vm381_vm0, %v438_v60, %v441_v61 }
 0x3af   :  { %v444_v0 = vsel %vm383_vm2, %v436_v62, %v443_v63 }
 0x3b0   :  { %v445_v1 = vadd.f32 %v522_v57, %v444_v0 }
 0x3b2   :  { %454 = vrot.lane.b32.xlu0 %v445_v1, %s585_s2  ;;  %450 = vrot.lane.b32.xlu2 %v445_v1, %s587_s19 }
 0x3b3   :  { %447 = vrot.lane.b32.xlu1 %v445_v1, %s586_s18 }
 0x3bb   :  { %457 = vrot.lane.b32.xlu1 %v445_v1, %s584_s6 }
 0x40c   :  { %v451_v3 = vpop.permute.xlu2 %450 }
 0x424   :  { %v455_v4 = vpop.permute.xlu0 %454 }
 0x425   :  { %v448_v2 = vpop.permute.xlu1 %447 }
 0x426   :  { %v453_v6 = vsel %vm393_vm3, %v448_v2, %v451_v3 }
 0x42d   :  { %v458_v5 = vpop.permute.xlu1 %457 }
 0x42e   :  { %v460_v7 = vsel %vm401_vm4, %v455_v4, %v458_v5 }
 0x42f   :  { %v461_v8 = vsel %vm403_vm5, %v453_v6, %v460_v7 }
 0x430   :  { %v462_v9 = vadd.f32 %v461_v8, %v445_v1 }
 0x432   :  { %471 = vrot.lane.b32.xlu1 %v462_v9, %s588_s20  ;;  %467 = vrot.lane.b32.xlu0 %v462_v9, %s589_s21 }
 0x433   :  { %464 = vrot.lane.b32.xlu2 %v462_v9, %s590_s22 }
 0x43b   :  { %474 = vrot.lane.b32.xlu2 %v462_v9, %s591_s23 }
 0x48d   :  { %v465_v10 = vpop.permute.xlu2 %464 }
 0x495   :  { %v475_v11 = vpop.permute.xlu2 %474 }
 0x4a4   :  { %v472_v12 = vpop.permute.xlu1 %471  ;;  %v468_v13 = vpop.permute.xlu0 %467 }
 0x4a5   :  { %v477_v14 = vsel %vm421_vm6, %v472_v12, %v475_v11  ;;  %v470_v15 = vsel %vm413_vm7, %v465_v10, %v468_v13 }
 0x4a6   :  { %v478_v16 = vsel %vm423_vm8, %v470_v15, %v477_v14 }
 0x4a7   :  { %v479_v17 = vadd.f32 %v478_v16, %v462_v9 }
 0x4a9   :  { %523 = vrcp.f32 %v479_v17 }
 0x4af   :  { %v524_v18 = vpop.eup %523 }
 0x4b0   :  { %v481_v19 = vmul.f32 %v524_v18, %v479_v17 }
 0x4b2   :  { %v482_v20 = vsub.f32 2.0, %v481_v19 }
 0x4b4   :  { %v483_v21 = vmul.f32 %v524_v18, %v482_v20 }
 0x4b6   :  { %v484_v22 = vmul.f32 %v522_v57, %v483_v21 }
 0x4b8   :  { %486 = vst.msk [vmem:[#allocation5] sm:$0xff] %vm485_vm9, %v484_v22 }
 0x4b9   :  { %497 = dma.vmem_to_hbm [thread:$0]  %s493_s0, 128, %s495_s26, [#allocation4]  }
 0x4ba   :  { %575 = dma.done.wait [#allocation4], 128  }
 0x4bb   :  { %576 = vsyncadd [#allocation4], 4294967168 }
 0x4bc   :  { %502 = vsyncpa [#allocation3], 1 }
 0x4bd   :  { %503 = vsyncpa [#allocation4], 1 }

</bundles_post_ra>
